<compile_context>
chip_gen: v7x
topology: tpu7x:2x2x1
jax: 0.10.0
libtpu: 0.0.40
codegen_flags: <defaults>
</compile_context>

<pallas_src>
import jax
import jax.numpy as jnp
from jax.experimental import pallas as pl
from jax.experimental.pallas import tpu as pltpu


def _round_up(x, m):
    return (x + m - 1) // m * m


def critic_kernel(state_ref, action_ref, w1_ref, w2_ref, w345_ref, w4a_ref,
                  w6_ref, w7_ref, b_ref, out_ref):
    f32 = jnp.float32
    bf16 = jnp.bfloat16
    relu = lambda v: jnp.maximum(v, 0.0)

    x = state_ref[...].astype(bf16)
    a = action_ref[...].astype(bf16)

    # Linear1 + ReLU : (B, S) @ (S, 256)
    h = relu(jnp.dot(x, w1_ref[...], preferred_element_type=f32)
             + b_ref[0:1, :])
    # Linear2 + ReLU : (B, 256) @ (256, 128)
    h = relu(jnp.dot(h.astype(bf16), w2_ref[...], preferred_element_type=f32)
             + b_ref[1:2, :128])
    # Linear3 + ReLU : (B, 128) @ (128, 128)
    h = relu(jnp.dot(h.astype(bf16), w345_ref[0], preferred_element_type=f32)
             + b_ref[2:3, :128])
    # cat(h, action) -> Linear4 + ReLU, as a split matmul:
    #   cat(h, a) @ W4 == h @ W4[:128, :] + a @ W4[128:, :]
    h = relu(jnp.dot(h.astype(bf16), w345_ref[1], preferred_element_type=f32)
             + jnp.dot(a, w4a_ref[...], preferred_element_type=f32)
             + b_ref[3:4, :128])
    # Linear5 + ReLU : (B, 128) @ (128, 128)
    h = relu(jnp.dot(h.astype(bf16), w345_ref[2], preferred_element_type=f32)
             + b_ref[4:5, :128])
    # Linear6 + ReLU : (B, 128) @ (128, 128)  (cols 48..127 / bias are zero)
    h = relu(jnp.dot(h.astype(bf16), w6_ref[...], preferred_element_type=f32)
             + b_ref[5:6, :128])
    # Linear7 (no activation) as VPU multiply + lane reduction against a
    # zero-padded (1, 128) row of W7.
    q = jnp.sum(h * w7_ref[...], axis=-1, keepdims=True) + b_ref[6:7, 0:1]

    out_ref[...] = q.astype(out_ref.dtype)


def init_linear_params(key, in_features, out_features):
    """Deterministic PyTorch-style nn.Linear init: U(-1/sqrt(fan_in), +)."""
    kw, kb = jax.random.split(key)
    bound = 1.0 / jnp.sqrt(jnp.float32(in_features))
    # Stored already transposed: (in_features, out_features) so x @ W == PyTorch.
    w = jax.random.uniform(kw, (in_features, out_features), jnp.float32,
                           -bound, bound)
    b = jax.random.uniform(kb, (out_features,), jnp.float32, -bound, bound)
    return w, b


def make_critic_params(key, num_states, num_actions):
    keys = jax.random.split(key, 7)
    w1, b1 = init_linear_params(keys[0], num_states, 256)
    w2, b2 = init_linear_params(keys[1], 256, 128)
    w3, b3 = init_linear_params(keys[2], 128, 128)
    w4, b4 = init_linear_params(keys[3], 128 + num_actions, 128)
    w5, b5 = init_linear_params(keys[4], 128, 128)
    w6, b6 = init_linear_params(keys[5], 128, 48)
    w7, b7 = init_linear_params(keys[6], 48, 1)

    s_pad = max(_round_up(num_states, 8), 8)
    a_pad = max(_round_up(num_actions, 8), 8)

    # Zero-pad feature dims (exactly equivalent: padded input columns hit zero
    # weight rows; padded output columns get zero weight cols + zero bias and
    # ReLU(0) = 0 feeds zero w7 lanes).
    w1p = jnp.zeros((s_pad, 256), jnp.float32).at[:num_states].set(w1)
    w4x = w4[:128]
    w4a = jnp.zeros((a_pad, 128), jnp.float32).at[:num_actions].set(w4[128:])
    w6p = jnp.zeros((128, 128), jnp.float32).at[:, :48].set(w6)
    w7row = jnp.zeros((1, 128), jnp.float32).at[0, :48].set(w7[:, 0])

    # Pack all biases into one (8, 256) f32 array (row layout documented in
    # critic_kernel); unused slots are zero.
    b_pack = jnp.zeros((8, 256), jnp.float32)
    b_pack = b_pack.at[0, :256].set(b1)
    b_pack = b_pack.at[1, :128].set(b2)
    b_pack = b_pack.at[2, :128].set(b3)
    b_pack = b_pack.at[3, :128].set(b4)
    b_pack = b_pack.at[4, :128].set(b5)
    b_pack = b_pack.at[5, :48].set(b6)
    b_pack = b_pack.at[6, 0].set(b7[0])

    w345 = jnp.stack([w3, w4x, w5], axis=0)  # (3, 128, 128)

    bf16 = jnp.bfloat16
    return dict(
        w1=w1p.astype(bf16),
        w2=w2.astype(bf16),
        w345=w345.astype(bf16),
        w4a=w4a.astype(bf16),
        w6=w6p.astype(bf16),
        w7=w7row,        # f32: used on the VPU, not the MXU
        b=b_pack,        # f32
    )


@jax.jit
def critic_forward(state, action, params):
    batch = state.shape[0]
    s_pad = params["w1"].shape[0]
    a_pad = params["w4a"].shape[0]

    # Batch tile: <= 512 rows keeps double-buffered activation tiles well under
    # v7x's 32 MiB scoped VMEM (weights ~190 KB bf16 stay resident).
    tile_b = min(512, _round_up(max(batch, 1), 8))
    b_pad = _round_up(batch, tile_b)
    n_tiles = b_pad // tile_b

    state_p = jnp.zeros((b_pad, s_pad), jnp.float32)
    state_p = state_p.at[:batch, :state.shape[1]].set(state.astype(jnp.float32))
    action_p = jnp.zeros((b_pad, a_pad), jnp.float32)
    action_p = action_p.at[:batch, :action.shape[1]].set(action.astype(jnp.float32))

    const2 = lambda i: (0, 0)
    const3 = lambda i: (0, 0, 0)

    out = pl.pallas_call(
        critic_kernel,
        out_shape=jax.ShapeDtypeStruct((b_pad, 1), jnp.float32),
        grid=(n_tiles,),
        in_specs=[
            pl.BlockSpec((tile_b, s_pad), lambda i: (i, 0)),
            pl.BlockSpec((tile_b, a_pad), lambda i: (i, 0)),
            pl.BlockSpec(params["w1"].shape, const2),
            pl.BlockSpec(params["w2"].shape, const2),
            pl.BlockSpec(params["w345"].shape, const3),
            pl.BlockSpec(params["w4a"].shape, const2),
            pl.BlockSpec(params["w6"].shape, const2),
            pl.BlockSpec(params["w7"].shape, const2),
            pl.BlockSpec(params["b"].shape, const2),
        ],
        out_specs=pl.BlockSpec((tile_b, 1), lambda i: (i, 0)),
        compiler_params=pltpu.CompilerParams(
            dimension_semantics=("parallel",),
            vmem_limit_bytes=32 * 1024 * 1024,
        ),
    )(state_p, action_p, params["w1"], params["w2"], params["w345"],
      params["w4a"], params["w6"], params["w7"], params["b"])

    return out[:batch]


def critic_reference(state, action, params):
    """Pure-JAX reference mirroring the kernel's dtype discipline exactly."""
    f32, bf16 = jnp.float32, jnp.bfloat16
    relu = jax.nn.relu
    s_pad = params["w1"].shape[0]
    a_pad = params["w4a"].shape[0]
    b = params["b"]
    w345 = params["w345"]

    x = jnp.zeros((state.shape[0], s_pad), f32).at[:, :state.shape[1]].set(state)
    a = jnp.zeros((action.shape[0], a_pad), f32).at[:, :action.shape[1]].set(action)

    dot = lambda u, w: jnp.dot(u.astype(bf16), w, preferred_element_type=f32)

    h = relu(dot(x, params["w1"]) + b[0:1, :])
    h = relu(dot(h, params["w2"]) + b[1:2, :128])
    h = relu(dot(h, w345[0]) + b[2:3, :128])
    h = relu(dot(h, w345[1]) + dot(a, params["w4a"]) + b[3:4, :128])
    h = relu(dot(h, w345[2]) + b[4:5, :128])
    h = relu(dot(h, params["w6"]) + b[5:6, :128])
    return jnp.sum(h * params["w7"], axis=-1, keepdims=True) + b[6:7, 0:1]


if __name__ == "__main__":
    num_states = 16
    num_actions = 4
    batch = 8

    root = jax.random.PRNGKey(0)
    k_params, k_state, k_action = jax.random.split(root, 3)

    params = make_critic_params(k_params, num_states, num_actions)
    state = jax.random.normal(k_state, (batch, num_states), jnp.float32)
    action = jax.random.normal(k_action, (batch, num_actions), jnp.float32)

    q = critic_forward(state, action, params)
    q = jax.block_until_ready(q)

    q_ref = critic_reference(state, action, params)
    assert q.shape == (batch, 1), q.shape
    max_err = jnp.max(jnp.abs(q - q_ref))
    assert jnp.allclose(q, q_ref, atol=2e-3, rtol=2e-3), f"max abs err {max_err}"

    print("KERNEL_OK")
</pallas_src>

<mosaic_0001>
module attributes {stable_mosaic.version = 11 : i64} {
  func.func @critic_kernel(%arg0: i32, %arg1: memref<8x16xf32, #tpu.memory_space<vmem>>, %arg2: memref<8x8xf32, #tpu.memory_space<vmem>>, %arg3: memref<16x256xbf16, #tpu.memory_space<vmem>>, %arg4: memref<256x128xbf16, #tpu.memory_space<vmem>>, %arg5: memref<3x128x128xbf16, #tpu.memory_space<vmem>>, %arg6: memref<8x128xbf16, #tpu.memory_space<vmem>>, %arg7: memref<128x128xbf16, #tpu.memory_space<vmem>>, %arg8: memref<1x128xf32, #tpu.memory_space<vmem>>, %arg9: memref<8x256xf32, #tpu.memory_space<vmem>>, %arg10: memref<8x1xf32, #tpu.memory_space<vmem>>) attributes {dimension_semantics = [#tpu.dimension_semantics<parallel>], iteration_bounds = array<i64: 1>, scalar_prefetch = 0 : i64, scratch_operands = 0 : i64, tpu.core_type = #tpu.core_type<tc>, window_params = [{transform_indices = @transform_0, window_bounds = array<i64: 8, 16>}, {transform_indices = @transform_1, window_bounds = array<i64: 8, 8>}, {pipeline_mode = #tpu.pipeline_mode<synchronous>, transform_indices = @transform_2, window_bounds = array<i64: 16, 256>}, {pipeline_mode = #tpu.pipeline_mode<synchronous>, transform_indices = @transform_3, window_bounds = array<i64: 256, 128>}, {pipeline_mode = #tpu.pipeline_mode<synchronous>, transform_indices = @transform_4, window_bounds = array<i64: 3, 128, 128>}, {pipeline_mode = #tpu.pipeline_mode<synchronous>, transform_indices = @transform_5, window_bounds = array<i64: 8, 128>}, {pipeline_mode = #tpu.pipeline_mode<synchronous>, transform_indices = @transform_6, window_bounds = array<i64: 128, 128>}, {pipeline_mode = #tpu.pipeline_mode<synchronous>, transform_indices = @transform_7, window_bounds = array<i64: 1, 128>}, {pipeline_mode = #tpu.pipeline_mode<synchronous>, transform_indices = @transform_8, window_bounds = array<i64: 8, 256>}, {transform_indices = @transform_9, window_bounds = array<i64: 8, 1>}]} {
    %c0 = arith.constant 0 : index
    %c0_0 = arith.constant 0 : index
    %0 = vector.load %arg1[%c0, %c0_0] : memref<8x16xf32, #tpu.memory_space<vmem>>, vector<8x16xf32>
    %1 = arith.truncf %0 : vector<8x16xf32> to vector<8x16xbf16>
    %c0_1 = arith.constant 0 : index
    %c0_2 = arith.constant 0 : index
    %2 = vector.load %arg2[%c0_1, %c0_2] : memref<8x8xf32, #tpu.memory_space<vmem>>, vector<8x8xf32>
    %3 = arith.truncf %2 : vector<8x8xf32> to vector<8x8xbf16>
    %c0_3 = arith.constant 0 : index
    %c0_4 = arith.constant 0 : index
    %4 = vector.load %arg3[%c0_3, %c0_4] : memref<16x256xbf16, #tpu.memory_space<vmem>>, vector<16x256xbf16>
    %cst = arith.constant dense<0.000000e+00> : vector<8x256xf32>
    %5 = tpu.matmul %1, %4, %cst {dimension_numbers = #tpu.dot_dimension_numbers<[1], [0], [0], [1], [0, 0, 1, 1], [], []>} : vector<8x16xbf16>, vector<16x256xbf16>, vector<8x256xf32> -> vector<8x256xf32>
    %c0_5 = arith.constant 0 : index
    %c0_6 = arith.constant 0 : index
    %6 = vector.load %arg9[%c0_5, %c0_6] : memref<8x256xf32, #tpu.memory_space<vmem>>, vector<1x256xf32>
    %7 = vector.broadcast %6 : vector<1x256xf32> to vector<8x256xf32>
    %8 = arith.addf %5, %7 : vector<8x256xf32>
    %cst_7 = arith.constant 0.000000e+00 : f32
    %9 = vector.broadcast %cst_7 : f32 to vector<8x256xf32>
    %10 = arith.maximumf %8, %9 : vector<8x256xf32>
    %11 = arith.truncf %10 : vector<8x256xf32> to vector<8x256xbf16>
    %c0_8 = arith.constant 0 : index
    %c0_9 = arith.constant 0 : index
    %12 = vector.load %arg4[%c0_8, %c0_9] : memref<256x128xbf16, #tpu.memory_space<vmem>>, vector<256x128xbf16>
    %cst_10 = arith.constant dense<0.000000e+00> : vector<8x128xf32>
    %13 = tpu.matmul %11, %12, %cst_10 {dimension_numbers = #tpu.dot_dimension_numbers<[1], [0], [0], [1], [0, 0, 1, 1], [], []>} : vector<8x256xbf16>, vector<256x128xbf16>, vector<8x128xf32> -> vector<8x128xf32>
    %c1 = arith.constant 1 : index
    %c0_11 = arith.constant 0 : index
    %14 = vector.load %arg9[%c1, %c0_11] : memref<8x256xf32, #tpu.memory_space<vmem>>, vector<1x128xf32>
    %15 = vector.broadcast %14 : vector<1x128xf32> to vector<8x128xf32>
    %16 = arith.addf %13, %15 : vector<8x128xf32>
    %cst_12 = arith.constant 0.000000e+00 : f32
    %17 = vector.broadcast %cst_12 : f32 to vector<8x128xf32>
    %18 = arith.maximumf %16, %17 : vector<8x128xf32>
    %19 = arith.truncf %18 : vector<8x128xf32> to vector<8x128xbf16>
    %c0_13 = arith.constant 0 : index
    %c0_14 = arith.constant 0 : index
    %c0_15 = arith.constant 0 : index
    %20 = vector.load %arg5[%c0_13, %c0_14, %c0_15] : memref<3x128x128xbf16, #tpu.memory_space<vmem>>, vector<1x128x128xbf16>
    %21 = vector.shape_cast %20 : vector<1x128x128xbf16> to vector<128x128xbf16>
    %cst_16 = arith.constant dense<0.000000e+00> : vector<8x128xf32>
    %22 = tpu.matmul %19, %21, %cst_16 {dimension_numbers = #tpu.dot_dimension_numbers<[1], [0], [0], [1], [0, 0, 1, 1], [], []>} : vector<8x128xbf16>, vector<128x128xbf16>, vector<8x128xf32> -> vector<8x128xf32>
    %c2 = arith.constant 2 : index
    %c0_17 = arith.constant 0 : index
    %23 = vector.load %arg9[%c2, %c0_17] : memref<8x256xf32, #tpu.memory_space<vmem>>, vector<1x128xf32>
    %24 = vector.broadcast %23 : vector<1x128xf32> to vector<8x128xf32>
    %25 = arith.addf %22, %24 : vector<8x128xf32>
    %cst_18 = arith.constant 0.000000e+00 : f32
    %26 = vector.broadcast %cst_18 : f32 to vector<8x128xf32>
    %27 = arith.maximumf %25, %26 : vector<8x128xf32>
    %28 = arith.truncf %27 : vector<8x128xf32> to vector<8x128xbf16>
    %c1_19 = arith.constant 1 : index
    %c0_20 = arith.constant 0 : index
    %c0_21 = arith.constant 0 : index
    %29 = vector.load %arg5[%c1_19, %c0_20, %c0_21] : memref<3x128x128xbf16, #tpu.memory_space<vmem>>, vector<1x128x128xbf16>
    %30 = vector.shape_cast %29 : vector<1x128x128xbf16> to vector<128x128xbf16>
    %cst_22 = arith.constant dense<0.000000e+00> : vector<8x128xf32>
    %31 = tpu.matmul %28, %30, %cst_22 {dimension_numbers = #tpu.dot_dimension_numbers<[1], [0], [0], [1], [0, 0, 1, 1], [], []>} : vector<8x128xbf16>, vector<128x128xbf16>, vector<8x128xf32> -> vector<8x128xf32>
    %c0_23 = arith.constant 0 : index
    %c0_24 = arith.constant 0 : index
    %32 = vector.load %arg6[%c0_23, %c0_24] : memref<8x128xbf16, #tpu.memory_space<vmem>>, vector<8x128xbf16>
    %cst_25 = arith.constant dense<0.000000e+00> : vector<8x128xf32>
    %33 = tpu.matmul %3, %32, %cst_25 {dimension_numbers = #tpu.dot_dimension_numbers<[1], [0], [0], [1], [0, 0, 1, 1], [], []>} : vector<8x8xbf16>, vector<8x128xbf16>, vector<8x128xf32> -> vector<8x128xf32>
    %34 = arith.addf %31, %33 : vector<8x128xf32>
    %c3 = arith.constant 3 : index
    %c0_26 = arith.constant 0 : index
    %35 = vector.load %arg9[%c3, %c0_26] : memref<8x256xf32, #tpu.memory_space<vmem>>, vector<1x128xf32>
    %36 = vector.broadcast %35 : vector<1x128xf32> to vector<8x128xf32>
    %37 = arith.addf %34, %36 : vector<8x128xf32>
    %cst_27 = arith.constant 0.000000e+00 : f32
    %38 = vector.broadcast %cst_27 : f32 to vector<8x128xf32>
    %39 = arith.maximumf %37, %38 : vector<8x128xf32>
    %40 = arith.truncf %39 : vector<8x128xf32> to vector<8x128xbf16>
    %c2_28 = arith.constant 2 : index
    %c0_29 = arith.constant 0 : index
    %c0_30 = arith.constant 0 : index
    %41 = vector.load %arg5[%c2_28, %c0_29, %c0_30] : memref<3x128x128xbf16, #tpu.memory_space<vmem>>, vector<1x128x128xbf16>
    %42 = vector.shape_cast %41 : vector<1x128x128xbf16> to vector<128x128xbf16>
    %cst_31 = arith.constant dense<0.000000e+00> : vector<8x128xf32>
    %43 = tpu.matmul %40, %42, %cst_31 {dimension_numbers = #tpu.dot_dimension_numbers<[1], [0], [0], [1], [0, 0, 1, 1], [], []>} : vector<8x128xbf16>, vector<128x128xbf16>, vector<8x128xf32> -> vector<8x128xf32>
    %c4 = arith.constant 4 : index
    %c0_32 = arith.constant 0 : index
    %44 = vector.load %arg9[%c4, %c0_32] : memref<8x256xf32, #tpu.memory_space<vmem>>, vector<1x128xf32>
    %45 = vector.broadcast %44 : vector<1x128xf32> to vector<8x128xf32>
    %46 = arith.addf %43, %45 : vector<8x128xf32>
    %cst_33 = arith.constant 0.000000e+00 : f32
    %47 = vector.broadcast %cst_33 : f32 to vector<8x128xf32>
    %48 = arith.maximumf %46, %47 : vector<8x128xf32>
    %49 = arith.truncf %48 : vector<8x128xf32> to vector<8x128xbf16>
    %c0_34 = arith.constant 0 : index
    %c0_35 = arith.constant 0 : index
    %50 = vector.load %arg7[%c0_34, %c0_35] : memref<128x128xbf16, #tpu.memory_space<vmem>>, vector<128x128xbf16>
    %cst_36 = arith.constant dense<0.000000e+00> : vector<8x128xf32>
    %51 = tpu.matmul %49, %50, %cst_36 {dimension_numbers = #tpu.dot_dimension_numbers<[1], [0], [0], [1], [0, 0, 1, 1], [], []>} : vector<8x128xbf16>, vector<128x128xbf16>, vector<8x128xf32> -> vector<8x128xf32>
    %c5 = arith.constant 5 : index
    %c0_37 = arith.constant 0 : index
    %52 = vector.load %arg9[%c5, %c0_37] : memref<8x256xf32, #tpu.memory_space<vmem>>, vector<1x128xf32>
    %53 = vector.broadcast %52 : vector<1x128xf32> to vector<8x128xf32>
    %54 = arith.addf %51, %53 : vector<8x128xf32>
    %cst_38 = arith.constant 0.000000e+00 : f32
    %55 = vector.broadcast %cst_38 : f32 to vector<8x128xf32>
    %56 = arith.maximumf %54, %55 : vector<8x128xf32>
    %c0_39 = arith.constant 0 : index
    %c0_40 = arith.constant 0 : index
    %57 = vector.load %arg8[%c0_39, %c0_40] : memref<1x128xf32, #tpu.memory_space<vmem>>, vector<1x128xf32>
    %58 = vector.broadcast %57 : vector<1x128xf32> to vector<8x128xf32>
    %59 = arith.mulf %56, %58 : vector<8x128xf32>
    %cst_41 = arith.constant dense<0.000000e+00> : vector<8xf32>
    %60 = vector.multi_reduction <add>, %59, %cst_41 [1] : vector<8x128xf32> to vector<8xf32>
    %61 = vector.shape_cast %60 : vector<8xf32> to vector<8x1xf32>
    %c6 = arith.constant 6 : index
    %c0_42 = arith.constant 0 : index
    %62 = vector.load %arg9[%c6, %c0_42] : memref<8x256xf32, #tpu.memory_space<vmem>>, vector<1x1xf32>
    %63 = vector.broadcast %62 : vector<1x1xf32> to vector<8x1xf32>
    %64 = arith.addf %61, %63 : vector<8x1xf32>
    %c0_43 = arith.constant 0 : index
    %c0_44 = arith.constant 0 : index
    %65 = vector.load %arg10[%c0_43, %c0_44] : memref<8x1xf32, #tpu.memory_space<vmem>>, vector<8x1xf32>
    tpu.vector_store %arg10[%c0_43, %c0_44], %64 {strides = array<i32>} : memref<8x1xf32, #tpu.memory_space<vmem>>, vector<8x1xf32>,
    return
  }
  func.func @transform_0(%arg0: i32) -> (i32, i32) {
    %c0_i32 = arith.constant 0 : i32
    %c0_i32_0 = arith.constant 0 : i32
    return %arg0, %c0_i32 : i32, i32
  }
  func.func @transform_1(%arg0: i32) -> (i32, i32) {
    %c0_i32 = arith.constant 0 : i32
    %c0_i32_0 = arith.constant 0 : i32
    return %arg0, %c0_i32 : i32, i32
  }
  func.func @transform_2(%arg0: i32) -> (i32, i32) {
    %c0_i32 = arith.constant 0 : i32
    %c0_i32_0 = arith.constant 0 : i32
    %c0_i32_1 = arith.constant 0 : i32
    return %c0_i32, %c0_i32_0 : i32, i32
  }
  func.func @transform_3(%arg0: i32) -> (i32, i32) {
    %c0_i32 = arith.constant 0 : i32
    %c0_i32_0 = arith.constant 0 : i32
    %c0_i32_1 = arith.constant 0 : i32
    return %c0_i32, %c0_i32_0 : i32, i32
  }
  func.func @transform_4(%arg0: i32) -> (i32, i32, i32) {
    %c0_i32 = arith.constant 0 : i32
    %c0_i32_0 = arith.constant 0 : i32
    %c0_i32_1 = arith.constant 0 : i32
    %c0_i32_2 = arith.constant 0 : i32
    return %c0_i32, %c0_i32_0, %c0_i32_1 : i32, i32, i32
  }
  func.func @transform_5(%arg0: i32) -> (i32, i32) {
    %c0_i32 = arith.constant 0 : i32
    %c0_i32_0 = arith.constant 0 : i32
    %c0_i32_1 = arith.constant 0 : i32
    return %c0_i32, %c0_i32_0 : i32, i32
  }
  func.func @transform_6(%arg0: i32) -> (i32, i32) {
    %c0_i32 = arith.constant 0 : i32
    %c0_i32_0 = arith.constant 0 : i32
    %c0_i32_1 = arith.constant 0 : i32
    return %c0_i32, %c0_i32_0 : i32, i32
  }
  func.func @transform_7(%arg0: i32) -> (i32, i32) {
    %c0_i32 = arith.constant 0 : i32
    %c0_i32_0 = arith.constant 0 : i32
    %c0_i32_1 = arith.constant 0 : i32
    return %c0_i32, %c0_i32_0 : i32, i32
  }
  func.func @transform_8(%arg0: i32) -> (i32, i32) {
    %c0_i32 = arith.constant 0 : i32
    %c0_i32_0 = arith.constant 0 : i32
    %c0_i32_1 = arith.constant 0 : i32
    return %c0_i32, %c0_i32_0 : i32, i32
  }
  func.func @transform_9(%arg0: i32) -> (i32, i32) {
    %c0_i32 = arith.constant 0 : i32
    %c0_i32_0 = arith.constant 0 : i32
    return %arg0, %c0_i32 : i32, i32
  }
}

</mosaic_0001>

<bundles_post_ra>
// kernel: critic_forward.1
= control target key start
LH: loop header
LB: loop body
LE: loop exit
PB: predicated region body
PF: predicated region fallthrough
CT: control target
= control target key end

     0   :  { %14 = vsyncpa [#allocation3], 0  ;;  %s1386_s0 = inlined_call_operand.vmem [shape: f32[8,16], index: 0, kind: input, shape index: {}]   ;;  %s1387_s1 = inlined_call_operand.vmem [shape: f32[8,8], index: 1, kind: input, shape index: {}]   ;;  %s1388_s2 = inlined_call_operand.hbm [shape: bf16[16,256], index: 2, kind: input, shape index: {}]   ;;  %s1389_s3 = inlined_call_operand.hbm [shape: bf16[256,128], index: 3, kind: input, shape index: {}]   ;;  %s1390_s4 = inlined_call_operand.hbm [shape: bf16[3,128,128], index: 4, kind: input, shape index: {}]   ;;  %s1391_s5 = inlined_call_operand.vmem [shape: bf16[8,128], index: 5, kind: input, shape index: {}]   ;;  %s1392_s6 = inlined_call_operand.vmem [shape: bf16[128,128], index: 6, kind: input, shape index: {}]   ;;  %s1393_s7 = inlined_call_operand.vmem [shape: f32[1,128], index: 7, kind: input, shape index: {}]   ;;  %s1394_s8 = inlined_call_operand.hbm [shape: f32[8,256], index: 8, kind: input, shape index: {}]   ;;  %s1395_s9 = inlined_call_operand.vmem [shape: f32[8,1], index: 9, kind: output, shape index: {}]  }
   0x1   :  { %15 = vsyncpa [#allocation5], 0 }
   0x2   :  { %16 = vsyncpa [#allocation8], 0  ;;  %s1189_s30 = smov [#allocation4]   ;;  %s1095_s13 = scalar_lea.hbm %s1389_s3, 2048 }
   0x3   :  { %s38_s10 = sshll.u32 %s1189_s30, 4  ;;  %p1096_p0 = scmp.ne.s32.totalorder %s1389_s3, %s1095_s13  ;;  %s39_s10 = int_to_ptr.vmem [resolvable:$true] %s38_s10 }
   0x4   :  { %p1099_p1 = scmp.lt.u32.totalorder %s1095_s13, %s1389_s3 }
   0x6   :  { %p1101_p2 = pnand %p1099_p1, %p1096_p0 }
   0x8   :  { %1104 = shalt.err (!%p1101_p2)
}
   0x9   :  { %s1105_s18 = scalar_lea.vmem %s39_s10, 2048  ;;  %p1110_p4 = scmp.lt.s32.totalorder %s39_s10, %s39_s10 }
   0xa   :  { %p1106_p3 = scmp.ne.s32.totalorder %s39_s10, %s1105_s18  ;;  %p1111_p5 = scmp.lt.s32.totalorder %s1105_s18, %s1105_s18 }
   0xc   :  { %p1112_p6 = por %p1111_p5, %p1110_p4 }
   0xe   :  { %p1113_p7 = pnand %p1112_p6, %p1106_p3 }
  0x10   :  { %1116 = shalt.err (!%p1113_p7)
}
  0x11   :  { %s1190_s19 = smov 64   ;;  %s1191_s20 = smov 4  }
  0x12   :  { %44 = dma.hbm_to_vmem [thread:$0]  %s1389_s3, 2048, %s39_s10, [#allocation5], %s1190_s19, %s1190_s19, %s1191_s20  }
  0x13   :  { %s1192_s23 = smov [#allocation2]   ;;  %s1117_s27 = scalar_lea.hbm %s1388_s2, 256 }
  0x14   :  { %s26_s24 = sshll.u32 %s1192_s23, 4  ;;  %p1118_p8 = scmp.ne.s32.totalorder %s1388_s2, %s1117_s27  ;;  %s27_s24 = int_to_ptr.vmem [resolvable:$true] %s26_s24 }
  0x15   :  { %p1121_p9 = scmp.lt.u32.totalorder %s1117_s27, %s1388_s2 }
  0x17   :  { %p1123_p10 = pnand %p1121_p9, %p1118_p8 }
  0x19   :  { %1126 = shalt.err (!%p1123_p10)
}
  0x1a   :  { %s1127_s12 = scalar_lea.vmem %s27_s24, 256  ;;  %p1132_p12 = scmp.lt.s32.totalorder %s27_s24, %s27_s24 }
  0x1b   :  { %p1128_p11 = scmp.ne.s32.totalorder %s27_s24, %s1127_s12  ;;  %p1133_p13 = scmp.lt.s32.totalorder %s1127_s12, %s1127_s12 }
  0x1d   :  { %p1134_p0 = por %p1133_p13, %p1132_p12 }
  0x1f   :  { %p1135_p1 = pnand %p1134_p0, %p1128_p11 }
  0x21   :  { %1138 = shalt.err (!%p1135_p1)
}
  0x22   :  { %s1193_s3 = smov 128   ;;  %s1194_s10 = smov 8  }
  0x23   :  { %32 = dma.hbm_to_vmem [thread:$0]  %s1388_s2, 256, %s27_s24, [#allocation3], %s1193_s3, %s1193_s3, %s1194_s10  }
  0x24   :  { %s1195_s15 = smov [#allocation6]   ;;  %s1196_s17 = smov [#allocation7]  }
  0x25   :  { %s50_s16 = sshll.u32 %s1195_s15, 4  ;;  %s69_s18 = sshll.u32 %s1196_s17, 4  ;;  %s51_s16 = int_to_ptr.vmem [resolvable:$true] %s50_s16  ;;  %s70_s18 = int_to_ptr.vmem [resolvable:$true] %s69_s18 }
  0x26   :  { %s1139_s23 = scalar_lea.hbm %s1390_s4, 3072 }
  0x27   :  { %p1140_p2 = scmp.ne.s32.totalorder %s1390_s4, %s1139_s23  ;;  %p1143_p3 = scmp.lt.u32.totalorder %s1139_s23, %s1390_s4 }
  0x29   :  { %p1145_p4 = pnand %p1143_p3, %p1140_p2 }
  0x2b   :  { %1148 = shalt.err (!%p1145_p4)
}
  0x2c   :  { %s1149_s2 = scalar_lea.vmem %s51_s16, 3072  ;;  %p1154_p6 = scmp.lt.s32.totalorder %s51_s16, %s51_s16 }
  0x2d   :  { %p1150_p5 = scmp.ne.s32.totalorder %s51_s16, %s1149_s2  ;;  %p1155_p7 = scmp.lt.s32.totalorder %s1149_s2, %s1149_s2 }
  0x2f   :  { %p1156_p8 = por %p1155_p7, %p1154_p6 }
  0x31   :  { %p1157_p9 = pnand %p1156_p8, %p1150_p5 }
  0x33   :  { %1160 = shalt.err (!%p1157_p9)
}
  0x34   :  { %56 = dma.hbm_to_vmem [thread:$0]  %s1390_s4, 3072, %s51_s16, [#allocation5], %s1190_s19, %s1190_s19, %s1191_s20  }
  0x35   :  { %s1161_s12 = scalar_lea.hbm %s1394_s8, 256 }
  0x36   :  { %p1162_p10 = scmp.ne.s32.totalorder %s1394_s8, %s1161_s12  ;;  %p1165_p11 = scmp.lt.u32.totalorder %s1161_s12, %s1394_s8 }
  0x38   :  { %p1167_p12 = pnand %p1165_p11, %p1162_p10 }
  0x3a   :  { %1170 = shalt.err (!%p1167_p12)
}
  0x3b   :  { %s1171_s15 = scalar_lea.vmem %s70_s18, 256  ;;  %p1176_p0 = scmp.lt.s32.totalorder %s70_s18, %s70_s18 }
  0x3c   :  { %p1172_p13 = scmp.ne.s32.totalorder %s70_s18, %s1171_s15  ;;  %p1177_p1 = scmp.lt.s32.totalorder %s1171_s15, %s1171_s15 }
  0x3e   :  { %p1178_p2 = por %p1177_p1, %p1176_p0 }
  0x40   :  { %p1179_p3 = pnand %p1178_p2, %p1172_p13 }
  0x42   :  { %1182 = shalt.err (!%p1179_p3)
}
  0x43   :  { %72 = dma.hbm_to_vmem [thread:$0]  %s1394_s8, 256, %s70_s18, [#allocation8]  }
  0x44   :  { %1183 = dma.done.wait [#allocation3], 256  }
  0x45   :  { %1184 = vsyncadd [#allocation3], 4294967040 }
  0x46   :  { %1185 = dma.done.wait [#allocation5], 5120  }
  0x47   :  { %1186 = vsyncadd [#allocation5], 4294962176 }
  0x48   :  { %1187 = dma.done.wait [#allocation8], 256  }
  0x49   :  { %1188 = vsyncadd [#allocation8], 4294967040  ;;  %v1197_v0 = vmov 0   ;;  %v1044_v1 = vld [vmem:[#allocation2 + $0x4] ss:$8 sps:$4 sm:$0xff]   ;;  %v1047_v5 = vld [vmem:[#allocation4 + $0x40] sm:$0xff]   ;;  %v94_v28 = vlaneseq }
  0x4a   :  { %150 = vmatprep.mubr.bf16.mxu1 %v1197_v0  ;;  %v1046_v2 = vld [vmem:[#allocation2] ss:$8 sps:$4 sm:$0xff]   ;;  %118 = vmatprep.subr.bf16.mxu1 %v1044_v1  ;;  %vm114_vm0 = vcmask 130048   ;;  %v1048_v6 = vld [vmem:[#allocation4] sm:$0xff]   ;;  %v1049_v7 = vld [vmem:[#allocation4 + $0x48] sm:$0xff]   ;;  %v1198_v22 = vmov 0.0  }
  0x4b   :  { %v86_v3 = vld [vmem:[%s1386_s0] sm:$0xff]  ;;  %119 = vmatpush1.bf16.msra.mxu1 %v1046_v2  ;;  %v1050_v8 = vld [vmem:[#allocation4 + $0x8] sm:$0xff]   ;;  %v1053_v11 = vld [vmem:[#allocation4 + $0x58] sm:$0xff]   ;;  %947 = vmatprep.subr.bf16.mxu0 %v1198_v22  ;;  %v95_v29 = vshrl.u32 %v94_v28, 7  ;;  %vm1199_vm1 = vmmov 0   ;;  %vm463_vm2 = vcmask 1043456  }
  0x4c   :  { %v87_v4 = vpack.c.bf16 %v86_v3, %v86_v3  ;;  %887 = vmatprep.subr.bf16.mxu1 %v1047_v5  ;;  %v1051_v9 = vld [vmem:[#allocation4 + $0x50] sm:$0xff]   ;;  %v1054_v12 = vld [vmem:[#allocation4 + $0x18] sm:$0xff]   ;;  %v1055_v13 = vld [vmem:[#allocation4 + $0x60] sm:$0xff]   ;;  %963 = vmatprep.mubr.msk.bf16.mxu0 %vm1199_vm1, %v1198_v22  ;;  %vm459_vm3 = vcmask 64512   ;;  %vm825_vm4 = vcmask 7168  }
  0x4d   :  { %v1052_v10 = vld [vmem:[#allocation4 + $0x10] sm:$0xff]   ;;  %v1056_v14 = vld [vmem:[#allocation4 + $0x20] sm:$0xff]   ;;  %v1057_v15 = vld [vmem:[#allocation4 + $0x68] sm:$0xff]   ;;  %v96_v30 = vsub.s32 0, %v95_v29  ;;  %v100_v32 = vsub.s32 1, %v95_v29 }
  0x4e   :  { %836 = vmatmul.mubr.msk.bf16.vlgmr.msra.gmra.mrb[0].mxu1 %vm114_vm0, %v87_v4  ;;  %v1058_v16 = vld [vmem:[#allocation4 + $0x28] sm:$0xff]   ;;  %v1059_v17 = vld [vmem:[#allocation4 + $0x70] sm:$0xff]   ;;  %v1061_v19 = vld [vmem:[#allocation4 + $0x78] sm:$0xff]  }
  0x4f   :  { %888 = vmatpush3.bf16.msra.mxu1 %v1048_v6  ;;  %v1060_v18 = vld [vmem:[#allocation4 + $0x30] sm:$0xff]   ;;  %v1062_v20 = vld [vmem:[#allocation4 + $0x38] sm:$0xff]   ;;  %v1063_v21 = vld [vmem:[#allocation6] sm:$0xff]  }
  0x50   :  { %889 = vmatprep.subr.bf16.mxu1 %v1049_v7  ;;  %948 = vmatpush3.bf16.msra.mxu0 %v1063_v21  ;;  %v1064_v23 = vld [vmem:[#allocation6 + $0x8] sm:$0xff]   ;;  %v1065_v24 = vld [vmem:[#allocation6 + $0x10] sm:$0xff]   ;;  %v1066_v25 = vld [vmem:[#allocation6 + $0x18] sm:$0xff]  }
  0x51   :  { %949 = vmatprep.subr.bf16.mxu0 %v1198_v22  ;;  %v1067_v26 = vld [vmem:[#allocation6 + $0x20] sm:$0xff]   ;;  %v1068_v27 = vld [vmem:[#allocation6 + $0x28] sm:$0xff]   ;;  %v1069_v45 = vld [vmem:[#allocation6 + $0x30] sm:$0xff]  }
  0x52   :  { %v92_v31 = vld [vmem:[#allocation7] ss:$8 sm:$0x3]  ;;  %v1070_v46 = vld [vmem:[#allocation6 + $0x38] sm:$0xff]   ;;  %v458_v47 = vld [vmem:[%s1391_s5] sm:$0xf] }
  0x53   :  { %890 = vmatpush3.bf16.msra.mxu1 %v1050_v8  ;;  %v97_v33 = vrot.slane %v92_v31, %v96_v30  ;;  %v101_v34 = vrot.slane %v92_v31, %v100_v32  ;;  %v465_v48 = vsel %vm463_vm2, %v458_v47, 0  ;;  %v195_v50 = vld [vmem:[#allocation7 + $0x1] ss:$0 sm:$0xff]  ;;  %v1072_v59 = vld [vmem:[#allocation6 + $0x48] sm:$0xff]   ;;  %v1073_v60 = vld [vmem:[#allocation6 + $0x50] sm:$0xff]  }
  0x54   :  { %891 = vmatprep.subr.bf16.mxu1 %v1051_v9  ;;  %950 = vmatpush3.bf16.msra.mxu0 %v1064_v23  ;;  %v1071_v57 = vld [vmem:[#allocation6 + $0x40] sm:$0xff]   ;;  %v1074_v61 = vld [vmem:[#allocation6 + $0x58] sm:$0xff]   ;;  %v1076_v63 = vld [vmem:[#allocation6 + $0x68] sm:$0xff]  }
  0x55   :  { %951 = vmatprep.subr.bf16.mxu0 %v1198_v22  ;;  %v1075_v62 = vld [vmem:[#allocation6 + $0x60] sm:$0xff]   ;;  %v1077_v0 = vld [vmem:[#allocation6 + $0x70] sm:$0xff]   ;;  %v1078_v3 = vld [vmem:[#allocation6 + $0x78] sm:$0xff]  }
  0x56   :  { %v88_v1 = vld [vmem:[%s1387_s1] sm:$0xff]  ;;  %v1079_v4 = vld [vmem:[#allocation6 + $0x80] sm:$0xff]   ;;  %v1080_v5 = vld [vmem:[#allocation6 + $0x88] sm:$0xff]  }
  0x57   :  { %892 = vmatpush3.bf16.msra.mxu1 %v1052_v10  ;;  %v89_v2 = vpack.c.bf16 %v88_v1, %v88_v1  ;;  %v1081_v6 = vld [vmem:[#allocation6 + $0x90] sm:$0xff]   ;;  %v1082_v7 = vld [vmem:[#allocation6 + $0x98] sm:$0xff]   ;;  %v1083_v8 = vld [vmem:[#allocation6 + $0xa0] sm:$0xff]  }
  0x58   :  { %893 = vmatprep.subr.bf16.mxu1 %v1053_v11  ;;  %952 = vmatpush3.bf16.msra.mxu0 %v1065_v24  ;;  %v1084_v9 = vld [vmem:[#allocation6 + $0xa8] sm:$0xff]   ;;  %v350_v10 = vld [vmem:[#allocation7 + $0x2] ss:$0 sm:$0xff]  ;;  %v1085_v23 = vld [vmem:[#allocation6 + $0xb0] sm:$0xff]  }
  0x59   :  { %953 = vmatprep.subr.bf16.mxu0 %v1198_v22  ;;  %v1086_v24 = vld [vmem:[#allocation6 + $0xb8] sm:$0xff]   ;;  %v1090_v28 = vld [vmem:[%s1392_s6 + $0x18] sm:$0xff]   ;;  %v1091_v29 = vld [vmem:[%s1392_s6 + $0x20] sm:$0xff]  }
  0x5a   :  { %v1092_v30 = vld [vmem:[%s1392_s6 + $0x28] sm:$0xff]   ;;  %v595_v32 = vld [vmem:[#allocation7 + $0x3] ss:$0 sm:$0xff] }
  0x5b   :  { %894 = vmatpush3.bf16.msra.mxu1 %v1054_v12 }
  0x5c   :  { %895 = vmatprep.subr.bf16.mxu1 %v1055_v13  ;;  %954 = vmatpush3.bf16.msra.mxu0 %v1066_v25  ;;  %v1087_v25 = vld [vmem:[%s1392_s6] sm:$0xff]  }
  0x5d   :  { %955 = vmatprep.subr.bf16.mxu0 %v1198_v22 }
  0x5f   :  { %896 = vmatpush3.bf16.msra.mxu1 %v1056_v14 }
  0x60   :  { %897 = vmatprep.subr.bf16.mxu1 %v1057_v15  ;;  %956 = vmatpush3.bf16.msra.mxu0 %v1067_v26  ;;  %v1088_v26 = vld [vmem:[%s1392_s6 + $0x8] sm:$0xff]  }
  0x61   :  { %957 = vmatprep.subr.bf16.mxu0 %v1198_v22 }
  0x63   :  { %898 = vmatpush3.bf16.msra.mxu1 %v1058_v16 }
  0x64   :  { %899 = vmatprep.subr.bf16.mxu1 %v1059_v17  ;;  %958 = vmatpush3.bf16.msra.mxu0 %v1068_v27  ;;  %v1089_v27 = vld [vmem:[%s1392_s6 + $0x10] sm:$0xff]  }
  0x65   :  { %959 = vmatprep.subr.bf16.mxu0 %v1198_v22 }
  0x67   :  { %900 = vmatpush3.bf16.msra.mxu1 %v1060_v18 }
  0x68   :  { %901 = vmatprep.subr.bf16.mxu1 %v1061_v19  ;;  %960 = vmatpush3.bf16.msra.mxu0 %v1069_v45 }
  0x69   :  { %961 = vmatprep.subr.bf16.mxu0 %v1198_v22 }
  0x6b   :  { %902 = vmatpush3.bf16.msra.mxu1 %v1062_v20 }
  0x6c   :  { %967 = vmatprep.subr.bf16.mxu1 %v1198_v22  ;;  %962 = vmatpush3.bf16.msra.mxu0 %v1070_v46 }
  0x6d   :  { %973 = vmatprep.subr.bf16.mxu0 %v1198_v22 }
 0x121   :  { %v152_v35 = vpop.f32.mrb[0].mxu1 }
 0x122   :  { %v153_v36 = vadd.f32 %v152_v35, %v97_v33  ;;  %v154_v37 = vpop.f32.mrb[1].mxu1 }
 0x123   :  { %v155_v38 = vadd.f32 %v154_v37, %v101_v34  ;;  %v156_v39 = vpop.f32.mrb[2].mxu1 }
 0x124   :  { %v159_v40 = vmax.f32 %v153_v36, 0.0  ;;  %v157_v41 = vpop.f32.mrb[3].mxu1 }
 0x125   :  { %v160_v42 = vmax.f32 %v155_v38, 0.0  ;;  %v1094_v41 = vld [vmem:[%s1392_s6 + $0x38] sm:$0xff]  }
 0x126   :  { %v161_v44 = vpack.c.bf16 %v159_v40, %v159_v40  ;;  %v1093_v40 = vld [vmem:[%s1392_s6 + $0x30] sm:$0xff]  }
 0x127   :  { %v162_v43 = vpack.c.bf16 %v160_v42, %v160_v42  ;;  %v616_v42 = vld [vmem:[#allocation7 + $0x4] ss:$0 sm:$0xff] }
 0x129   :  { %324 = vmatprep.mubr.bf16.mxu1 %v162_v43 }
 0x12a   :  { %325 = vmatmul.mubr.bf16.vlgmr.msra.gmra.mrb[4].mxu1 %v161_v44 }
 0x12b   :  { %969 = vmatprep.mubr.msk.bf16.mxu1 %vm1199_vm1, %v1198_v22  ;;  %968 = vmatpush3.bf16.msra.mxu1 %v465_v48 }
 0x12c   :  { %993 = vmatprep.subr.bf16.mxu1 %v1198_v22 }
 0x132   :  { %970 = vmatmul.mubr.msk.bf16.vlgmr.msra.gmra.mrb[8].mxu1 %vm459_vm3, %v89_v2 }
 0x133   :  { %1009 = vmatprep.mubr.msk.bf16.mxu1 %vm1199_vm1, %v1198_v22  ;;  %994 = vmatpush3.bf16.msra.mxu1 %v1079_v4 }
 0x134   :  { %995 = vmatprep.subr.bf16.mxu1 %v1198_v22 }
 0x137   :  { %996 = vmatpush3.bf16.msra.mxu1 %v1080_v5 }
 0x138   :  { %997 = vmatprep.subr.bf16.mxu1 %v1198_v22 }
 0x13b   :  { %998 = vmatpush3.bf16.msra.mxu1 %v1081_v6 }
 0x13c   :  { %999 = vmatprep.subr.bf16.mxu1 %v1198_v22 }
 0x13f   :  { %1000 = vmatpush3.bf16.msra.mxu1 %v1082_v7 }
 0x140   :  { %1001 = vmatprep.subr.bf16.mxu1 %v1198_v22 }
 0x143   :  { %1002 = vmatpush3.bf16.msra.mxu1 %v1083_v8 }
 0x144   :  { %1003 = vmatprep.subr.bf16.mxu1 %v1198_v22 }
 0x147   :  { %1004 = vmatpush3.bf16.msra.mxu1 %v1084_v9 }
 0x148   :  { %1005 = vmatprep.subr.bf16.mxu1 %v1198_v22 }
 0x14b   :  { %1006 = vmatpush3.bf16.msra.mxu1 %v1085_v23 }
 0x14c   :  { %1007 = vmatprep.subr.bf16.mxu1 %v1198_v22 }
 0x14f   :  { %1008 = vmatpush3.bf16.msra.mxu1 %v1086_v24 }
 0x1fd   :  { %v903_v49 = vpop.f32.mrb[4].mxu1 }
 0x1fe   :  { %v904_v51 = vpop.f32.mrb[5].mxu1 }
 0x1ff   :  { %v905_v52 = vadd.f32 %v904_v51, %v903_v49  ;;  %v906_v53 = vpop.f32.mrb[6].mxu1 }
 0x200   :  { %v907_v54 = vpop.f32.mrb[7].mxu1 }
 0x201   :  { %v327_v55 = vadd.f32 %v905_v52, %v195_v50  ;;  %v723_v50 = vld [vmem:[#allocation7 + $0x5] ss:$0 sm:$0xff] }
 0x203   :  { %v332_v56 = vmax.f32 %v327_v55, 0.0 }
 0x205   :  { %v333_v58 = vpack.c.bf16 %v332_v56, %v332_v56  ;;  %v501_v18 = vpop.f32.mrb[8].mxu1 }
 0x206   :  { %v971_v19 = vpop.f32.mrb[9].mxu1 }
 0x207   :  { %964 = vmatmul.mubr.bf16.vlgmr.msra.gmra.mrb[0].mxu0 %v333_v58  ;;  %v504_v20 = vpop.f32.mrb[10].mxu1  ;;  %v823_v58 = vld [vmem:[#allocation7 + $0x6] ss:$0 sm:$0xff] }
 0x208   :  { %974 = vmatpush3.bf16.msra.mxu0 %v1071_v57  ;;  %989 = vmatprep.mubr.msk.bf16.mxu0 %vm1199_vm1, %v1198_v22  ;;  %v972_v21 = vpop.f32.mrb[11].mxu1 }
 0x209   :  { %975 = vmatprep.subr.bf16.mxu0 %v1198_v22 }
 0x20c   :  { %976 = vmatpush3.bf16.msra.mxu0 %v1072_v59 }
 0x20d   :  { %977 = vmatprep.subr.bf16.mxu0 %v1198_v22 }
 0x210   :  { %978 = vmatpush3.bf16.msra.mxu0 %v1073_v60 }
 0x211   :  { %979 = vmatprep.subr.bf16.mxu0 %v1198_v22 }
 0x214   :  { %980 = vmatpush3.bf16.msra.mxu0 %v1074_v61 }
 0x215   :  { %981 = vmatprep.subr.bf16.mxu0 %v1198_v22 }
 0x218   :  { %982 = vmatpush3.bf16.msra.mxu0 %v1075_v62 }
 0x219   :  { %983 = vmatprep.subr.bf16.mxu0 %v1198_v22 }
 0x21c   :  { %984 = vmatpush3.bf16.msra.mxu0 %v1076_v63 }
 0x21d   :  { %985 = vmatprep.subr.bf16.mxu0 %v1198_v22 }
 0x220   :  { %986 = vmatpush3.bf16.msra.mxu0 %v1077_v0 }
 0x221   :  { %987 = vmatprep.subr.bf16.mxu0 %v1198_v22 }
 0x224   :  { %988 = vmatpush3.bf16.msra.mxu0 %v1078_v3 }
 0x225   :  { %1013 = vmatprep.subr.bf16.mxu0 %v1198_v22 }
 0x2da   :  { %v433_v11 = vpop.f32.mrb[0].mxu0 }
 0x2db   :  { %v434_v12 = vadd.f32 %v433_v11, %v350_v10  ;;  %v965_v13 = vpop.f32.mrb[1].mxu0 }
 0x2dc   :  { %v436_v14 = vpop.f32.mrb[2].mxu0 }
 0x2dd   :  { %v439_v15 = vmax.f32 %v434_v12, 0.0  ;;  %v966_v16 = vpop.f32.mrb[3].mxu0 }
 0x2df   :  { %v440_v17 = vpack.c.bf16 %v439_v15, %v439_v15 }
 0x2e1   :  { %990 = vmatmul.mubr.bf16.vlgmr.msra.gmra.mrb[4].mxu0 %v440_v17 }
 0x2e2   :  { %1029 = vmatprep.mubr.msk.bf16.mxu0 %vm1199_vm1, %v1198_v22  ;;  %1014 = vmatpush3.bf16.msra.mxu0 %v1087_v25 }
 0x2e3   :  { %1015 = vmatprep.subr.bf16.mxu0 %v1198_v22 }
 0x2e6   :  { %1016 = vmatpush3.bf16.msra.mxu0 %v1088_v26 }
 0x2e7   :  { %1017 = vmatprep.subr.bf16.mxu0 %v1198_v22 }
 0x2ea   :  { %1018 = vmatpush3.bf16.msra.mxu0 %v1089_v27 }
 0x2eb   :  { %1019 = vmatprep.subr.bf16.mxu0 %v1198_v22 }
 0x2ee   :  { %1020 = vmatpush3.bf16.msra.mxu0 %v1090_v28 }
 0x2ef   :  { %1021 = vmatprep.subr.bf16.mxu0 %v1198_v22 }
 0x2f2   :  { %1022 = vmatpush3.bf16.msra.mxu0 %v1091_v29 }
 0x2f3   :  { %1023 = vmatprep.subr.bf16.mxu0 %v1198_v22 }
 0x2f6   :  { %1024 = vmatpush3.bf16.msra.mxu0 %v1092_v30 }
 0x2f7   :  { %1025 = vmatprep.subr.bf16.mxu0 %v1198_v22 }
 0x2fa   :  { %1026 = vmatpush3.bf16.msra.mxu0 %v1093_v40 }
 0x2fb   :  { %1027 = vmatprep.subr.bf16.mxu0 %v1198_v22  ;;  %v886_v22 = vld [vmem:[%s1393_s7] ss:$0 sm:$0xff] }
 0x2fe   :  { %1028 = vmatpush3.bf16.msra.mxu0 %v1094_v41 }
 0x3b4   :  { %v589_v31 = vpop.f32.mrb[4].mxu0 }
 0x3b5   :  { %v590_v33 = vadd.f32 %v589_v31, %v501_v18  ;;  %v991_v34 = vpop.f32.mrb[5].mxu0 }
 0x3b6   :  { %v592_v35 = vpop.f32.mrb[6].mxu0 }
 0x3b7   :  { %v596_v36 = vadd.f32 %v595_v32, %v590_v33  ;;  %v992_v37 = vpop.f32.mrb[7].mxu0 }
 0x3b9   :  { %v597_v38 = vmax.f32 %v596_v36, 0.0 }
 0x3bb   :  { %v598_v39 = vpack.c.bf16 %v597_v38, %v597_v38 }
 0x3bd   :  { %1010 = vmatmul.mubr.bf16.vlgmr.msra.gmra.mrb[12].mxu1 %v598_v39 }
 0x490   :  { %v699_v43 = vpop.f32.mrb[12].mxu1 }
 0x491   :  { %v700_v44 = vadd.f32 %v699_v43, %v616_v42  ;;  %v1011_v45 = vpop.f32.mrb[13].mxu1 }
 0x492   :  { %v702_v46 = vpop.f32.mrb[14].mxu1 }
 0x493   :  { %v705_v47 = vmax.f32 %v700_v44, 0.0  ;;  %v1012_v48 = vpop.f32.mrb[15].mxu1 }
 0x495   :  { %v706_v49 = vpack.c.bf16 %v705_v47, %v705_v47 }
 0x497   :  { %1030 = vmatmul.mubr.bf16.vlgmr.msra.gmra.mrb[8].mxu0 %v706_v49 }
 0x56a   :  { %v806_v51 = vpop.f32.mrb[8].mxu0 }
 0x56b   :  { %v807_v52 = vadd.f32 %v806_v51, %v723_v50  ;;  %v1031_v53 = vpop.f32.mrb[9].mxu0 }
 0x56c   :  { %v809_v54 = vpop.f32.mrb[10].mxu0 }
 0x56d   :  { %v812_v55 = vmax.f32 %v807_v52, 0.0  ;;  %v1032_v56 = vpop.f32.mrb[11].mxu0 }
 0x56f   :  { %v820_v57 = vmul.f32 %v886_v22, %v812_v55 }
 0x571   :  { %821 = vadd.xlane.f32.xlu0 %v820_v57 }
 0x5fe   :  { %v822_v59 = vpop.xlane.xlu0 %821 }
 0x5ff   :  { %v824_v60 = vadd.f32 %v823_v58, %v822_v59 }
 0x601   :  { %826 = vst.msk [vmem:[%s1395_s9] sm:$0xff] %vm825_vm4, %v824_v60 }
 0x602   :  { %831 = vsyncpa [#allocation3], 1 }
 0x603   :  { %832 = vsyncpa [#allocation5], 1 }
 0x604   :  { %833 = vsyncpa [#allocation8], 1 }

</bundles_post_ra>
